<compile_context>
chip_gen: v6e
topology: v6e:2x2x1
jax: 0.10.0
libtpu: 0.0.40
codegen_flags: <defaults>
</compile_context>

<pallas_src>
import math

import jax
import jax.numpy as jnp
from jax.experimental import pallas as pl
from jax.experimental.pallas import tpu as pltpu  # noqa: F401  (TPU backend)

# ---- synthetic-encoder dimensions (small stand-ins for BERT's 768/3072) ----
B = 2          # batch
S = 8          # sequence length
H = 128        # hidden size (gloss_hdim)
FF = 512       # feed-forward inner dim (4 * H)
VOCAB = 64
LN_EPS = 1e-12
NEG_BIG = -1e9

# row layout of the packed (16, H) vector operand
_BQ, _BK, _BV, _BO, _G1, _BE1, _C2, _G2, _BE2 = range(9)
_NVEC = 16     # padded to a sublane multiple


def _layer_norm(x, gamma, beta):
    mu = jnp.mean(x, axis=-1, keepdims=True)
    var = jnp.mean((x - mu) ** 2, axis=-1, keepdims=True)
    return (x - mu) * jax.lax.rsqrt(var + LN_EPS) * gamma + beta


def gloss_encoder_kernel(x_ref, mask_ref, wqkvo_ref, vecs_ref,
                         w1_ref, c1_ref, w2_ref, o_ref):
    x = x_ref[...]                                    # (B, S, H) f32
    vecs = vecs_ref[...]                              # (16, H)   f32

    # ---- fused QKV projection: one MXU push, bf16 weights, f32 accumulation ----
    x2 = x.reshape(B * S, H).astype(jnp.bfloat16)     # (B*S, H)
    qkv = jnp.dot(x2, wqkvo_ref[:, : 3 * H],
                  preferred_element_type=jnp.float32)  # (B*S, 3H)
    qkv = qkv.reshape(B, S, 3 * H)

    # Only the CLS row is ever emitted -> q for row 0 only; K/V for all rows.
    q0 = qkv[:, 0:1, 0:H] + vecs[_BQ:_BQ + 1]         # (B, 1, H)  (scale folded into wq)
    k = qkv[:, :, H:2 * H] + vecs[_BK:_BK + 1]        # (B, S, H)
    v = qkv[:, :, 2 * H:3 * H] + vecs[_BV:_BV + 1]    # (B, S, H)

    # ---- masked softmax over keys (query length 1: VPU mul + XLU lane-reduce) ----
    scores = jnp.sum(q0 * k, axis=-1)                 # (B, S)
    scores = scores + (1.0 - mask_ref[...]) * NEG_BIG
    scores = scores - jnp.max(scores, axis=-1, keepdims=True)
    p = jnp.exp(scores)
    p = p * pl.reciprocal(jnp.sum(p, axis=-1, keepdims=True), approx=True)

    attn = jnp.sum(p[:, :, None] * v, axis=1)         # (B, H)

    # ---- output projection + residual + LN (CLS row only) ----
    proj = jnp.dot(attn.astype(jnp.bfloat16), wqkvo_ref[:, 3 * H:],
                   preferred_element_type=jnp.float32) + vecs[_BO:_BO + 1]
    x0 = x[:, 0, :]                                   # (B, H)
    h = _layer_norm(x0 + proj, vecs[_G1:_G1 + 1], vecs[_BE1:_BE1 + 1])

    # ---- feed-forward (CLS row only) ----
    ff = jnp.dot(h.astype(jnp.bfloat16), w1_ref[...],
                 preferred_element_type=jnp.float32) + c1_ref[...]
    ff = jax.nn.gelu(ff, approximate=True)
    ff = jnp.dot(ff.astype(jnp.bfloat16), w2_ref[...],
                 preferred_element_type=jnp.float32) + vecs[_C2:_C2 + 1]

    out = _layer_norm(h + ff, vecs[_G2:_G2 + 1], vecs[_BE2:_BE2 + 1])
    o_ref[...] = out.astype(o_ref.dtype)              # == gloss_output[:, 0, :]


def init_params(key):
    ks = jax.random.split(key, 16)
    sd = 0.02
    p = {
        "tok_emb": sd * jax.random.normal(ks[0], (VOCAB, H), jnp.float32),
        "pos_emb": sd * jax.random.normal(ks[1], (S, H), jnp.float32),
        "wq": sd * jax.random.normal(ks[2], (H, H), jnp.float32),
        "bq": jnp.zeros((1, H), jnp.float32),
        "wk": sd * jax.random.normal(ks[3], (H, H), jnp.float32),
        "bk": jnp.zeros((1, H), jnp.float32),
        "wv": sd * jax.random.normal(ks[4], (H, H), jnp.float32),
        "bv": jnp.zeros((1, H), jnp.float32),
        "wo": sd * jax.random.normal(ks[5], (H, H), jnp.float32),
        "bo": jnp.zeros((1, H), jnp.float32),
        "g1": jnp.ones((1, H), jnp.float32),
        "be1": jnp.zeros((1, H), jnp.float32),
        "w1": sd * jax.random.normal(ks[6], (H, FF), jnp.float32),
        "c1": jnp.zeros((1, FF), jnp.float32),
        "w2": sd * jax.random.normal(ks[7], (FF, H), jnp.float32),
        "c2": jnp.zeros((1, H), jnp.float32),
        "g2": jnp.ones((1, H), jnp.float32),
        "be2": jnp.zeros((1, H), jnp.float32),
    }
    # self.rnn = nn.RNN(768, 768, 1): declared in __init__ but NEVER used in
    # forward(); initialized deterministically for parity, unused below.
    rk = jax.random.split(ks[8], 4)
    bound = 1.0 / math.sqrt(768.0)
    p["rnn_weight_ih_l0"] = jax.random.uniform(rk[0], (768, 768), jnp.float32, -bound, bound)
    p["rnn_weight_hh_l0"] = jax.random.uniform(rk[1], (768, 768), jnp.float32, -bound, bound)
    p["rnn_bias_ih_l0"] = jax.random.uniform(rk[2], (768,), jnp.float32, -bound, bound)
    p["rnn_bias_hh_l0"] = jax.random.uniform(rk[3], (768,), jnp.float32, -bound, bound)
    return p


def pack_params(p):
    """One-time packing: stack weights/vectors, fold 1/sqrt(H), cast big weights to bf16."""
    wq_scaled = p["wq"] * (1.0 / math.sqrt(H))
    w_qkvo = jnp.concatenate([wq_scaled, p["wk"], p["wv"], p["wo"]], axis=1)  # (H, 4H)
    rows = jnp.concatenate([p["bq"], p["bk"], p["bv"], p["bo"], p["g1"],
                            p["be1"], p["c2"], p["g2"], p["be2"]], axis=0)    # (9, H)
    vecs = jnp.zeros((_NVEC, H), jnp.float32).at[:rows.shape[0]].set(rows)
    return {
        "tok_emb": p["tok_emb"],
        "pos_emb": p["pos_emb"],
        "w_qkvo": w_qkvo.astype(jnp.bfloat16),
        "vecs": vecs,
        "w1": p["w1"].astype(jnp.bfloat16),
        "c1": p["c1"],
        "w2": p["w2"].astype(jnp.bfloat16),
    }


@jax.jit
def gloss_encoder3_forward(packed, input_ids, attn_mask):
    """Pallas implementation of GlossEncoder3.forward(input_ids, attn_mask)."""
    # Embedding gather stays in the JAX wrapper (tiny); encoder hot path in the kernel.
    x = packed["tok_emb"][input_ids] + packed["pos_emb"][None, :, :]   # (B, S, H)
    mask_f = attn_mask.astype(jnp.float32)                             # (B, S)

    # Single program, no grid: all operands mapped whole into VMEM (< 0.5 MiB).
    out = pl.pallas_call(
        gloss_encoder_kernel,
        out_shape=jax.ShapeDtypeStruct((B, H), jnp.float32),
    )(x, mask_f, packed["w_qkvo"], packed["vecs"],
      packed["w1"], packed["c1"], packed["w2"])
    return out


def reference_forward(packed, input_ids, attn_mask):
    """Pure-JAX reference mirroring the kernel math (same bf16 casts)."""
    bf = lambda a: a.astype(jnp.bfloat16)
    vecs = packed["vecs"]
    x = packed["tok_emb"][input_ids] + packed["pos_emb"][None, :, :]
    mask = attn_mask.astype(jnp.float32)

    def ln(v, g, be):
        mu = jnp.mean(v, -1, keepdims=True)
        var = jnp.mean((v - mu) ** 2, -1, keepdims=True)
        return (v - mu) * jax.lax.rsqrt(var + LN_EPS) * g + be

    qkv = jnp.dot(bf(x.reshape(B * S, H)), packed["w_qkvo"][:, :3 * H],
                  preferred_element_type=jnp.float32).reshape(B, S, 3 * H)
    q0 = qkv[:, 0:1, :H] + vecs[_BQ:_BQ + 1]
    k = qkv[:, :, H:2 * H] + vecs[_BK:_BK + 1]
    v = qkv[:, :, 2 * H:] + vecs[_BV:_BV + 1]
    scores = jnp.sum(q0 * k, axis=-1) + (1.0 - mask) * NEG_BIG
    p = jax.nn.softmax(scores, axis=-1)
    attn = jnp.sum(p[:, :, None] * v, axis=1)
    proj = jnp.dot(bf(attn), packed["w_qkvo"][:, 3 * H:],
                   preferred_element_type=jnp.float32) + vecs[_BO:_BO + 1]
    h = ln(x[:, 0, :] + proj, vecs[_G1:_G1 + 1], vecs[_BE1:_BE1 + 1])
    ff = jax.nn.gelu(jnp.dot(bf(h), packed["w1"], preferred_element_type=jnp.float32)
                     + packed["c1"], approximate=True)
    ff = jnp.dot(bf(ff), packed["w2"], preferred_element_type=jnp.float32) + vecs[_C2:_C2 + 1]
    return ln(h + ff, vecs[_G2:_G2 + 1], vecs[_BE2:_BE2 + 1])


if __name__ == "__main__":
    key = jax.random.PRNGKey(0)
    pkey, dkey = jax.random.split(key)
    params = init_params(pkey)
    packed = pack_params(params)

    # deterministic example inputs: token ids + attention mask with padding
    input_ids = jax.random.randint(dkey, (B, S), 0, VOCAB, dtype=jnp.int32)
    attn_mask = jnp.array([[1] * S, [1] * (S - 3) + [0] * 3], dtype=jnp.int32)

    out = jax.block_until_ready(gloss_encoder3_forward(packed, input_ids, attn_mask))
    assert out.shape == (B, H), out.shape

    ref = jax.block_until_ready(reference_forward(packed, input_ids, attn_mask))
    assert jnp.allclose(out, ref, rtol=5e-3, atol=5e-3), "mismatch vs reference"

    print("KERNEL_OK")
</pallas_src>

<mosaic_0001>
module attributes {stable_mosaic.version = 11 : i64} {
  func.func @gloss_encoder_kernel(%arg0: memref<2x8x128xf32, #tpu.memory_space<vmem>>, %arg1: memref<2x8xf32, #tpu.memory_space<vmem>>, %arg2: memref<128x512xbf16, #tpu.memory_space<vmem>>, %arg3: memref<16x128xf32, #tpu.memory_space<vmem>>, %arg4: memref<128x512xbf16, #tpu.memory_space<vmem>>, %arg5: memref<1x512xf32, #tpu.memory_space<vmem>>, %arg6: memref<512x128xbf16, #tpu.memory_space<vmem>>, %arg7: memref<2x128xf32, #tpu.memory_space<vmem>>) attributes {dimension_semantics = [], scalar_prefetch = 0 : i64, scratch_operands = 0 : i64, tpu.core_type = #tpu.core_type<tc>} {
    %c0 = arith.constant 0 : index
    %c0_0 = arith.constant 0 : index
    %c0_1 = arith.constant 0 : index
    %0 = vector.load %arg0[%c0, %c0_0, %c0_1] : memref<2x8x128xf32, #tpu.memory_space<vmem>>, vector<2x8x128xf32>
    %c0_2 = arith.constant 0 : index
    %c0_3 = arith.constant 0 : index
    %1 = vector.load %arg3[%c0_2, %c0_3] : memref<16x128xf32, #tpu.memory_space<vmem>>, vector<16x128xf32>
    %2 = vector.shape_cast %0 : vector<2x8x128xf32> to vector<16x128xf32>
    %3 = arith.truncf %2 : vector<16x128xf32> to vector<16x128xbf16>
    %c0_4 = arith.constant 0 : index
    %c0_5 = arith.constant 0 : index
    %4 = vector.load %arg2[%c0_4, %c0_5] : memref<128x512xbf16, #tpu.memory_space<vmem>>, vector<128x384xbf16>
    %cst = arith.constant dense<0.000000e+00> : vector<16x384xf32>
    %5 = tpu.matmul %3, %4, %cst {dimension_numbers = #tpu.dot_dimension_numbers<[1], [0], [0], [1], [0, 0, 1, 1], [], []>} : vector<16x128xbf16>, vector<128x384xbf16>, vector<16x384xf32> -> vector<16x384xf32>
    %6 = vector.shape_cast %5 : vector<16x384xf32> to vector<2x8x384xf32>
    %7 = vector.extract_strided_slice %6 {offsets = [0, 0, 0], sizes = [2, 1, 128], strides = [1, 1, 1]} : vector<2x8x384xf32> to vector<2x1x128xf32>
    %8 = vector.extract_strided_slice %1 {offsets = [0, 0], sizes = [1, 128], strides = [1, 1]} : vector<16x128xf32> to vector<1x128xf32>
    %9 = vector.shape_cast %8 : vector<1x128xf32> to vector<1x1x128xf32>
    %10 = vector.broadcast %9 : vector<1x1x128xf32> to vector<2x1x128xf32>
    %11 = arith.addf %7, %10 : vector<2x1x128xf32>
    %12 = vector.extract_strided_slice %6 {offsets = [0, 0, 128], sizes = [2, 8, 128], strides = [1, 1, 1]} : vector<2x8x384xf32> to vector<2x8x128xf32>
    %13 = vector.extract_strided_slice %1 {offsets = [1, 0], sizes = [1, 128], strides = [1, 1]} : vector<16x128xf32> to vector<1x128xf32>
    %14 = vector.shape_cast %13 : vector<1x128xf32> to vector<1x1x128xf32>
    %15 = vector.broadcast %14 : vector<1x1x128xf32> to vector<2x8x128xf32>
    %16 = arith.addf %12, %15 : vector<2x8x128xf32>
    %17 = vector.extract_strided_slice %6 {offsets = [0, 0, 256], sizes = [2, 8, 128], strides = [1, 1, 1]} : vector<2x8x384xf32> to vector<2x8x128xf32>
    %18 = vector.extract_strided_slice %1 {offsets = [2, 0], sizes = [1, 128], strides = [1, 1]} : vector<16x128xf32> to vector<1x128xf32>
    %19 = vector.shape_cast %18 : vector<1x128xf32> to vector<1x1x128xf32>
    %20 = vector.broadcast %19 : vector<1x1x128xf32> to vector<2x8x128xf32>
    %21 = arith.addf %17, %20 : vector<2x8x128xf32>
    %22 = vector.broadcast %11 : vector<2x1x128xf32> to vector<2x8x128xf32>
    %23 = arith.mulf %22, %16 : vector<2x8x128xf32>
    %cst_6 = arith.constant dense<0.000000e+00> : vector<2x8xf32>
    %24 = vector.multi_reduction <add>, %23, %cst_6 [2] : vector<2x8x128xf32> to vector<2x8xf32>
    %c0_7 = arith.constant 0 : index
    %c0_8 = arith.constant 0 : index
    %25 = vector.load %arg1[%c0_7, %c0_8] : memref<2x8xf32, #tpu.memory_space<vmem>>, vector<2x8xf32>
    %cst_9 = arith.constant 1.000000e+00 : f32
    %26 = vector.broadcast %cst_9 : f32 to vector<2x8xf32>
    %27 = arith.subf %26, %25 : vector<2x8xf32>
    %cst_10 = arith.constant -1.000000e+09 : f32
    %28 = vector.broadcast %cst_10 : f32 to vector<2x8xf32>
    %29 = arith.mulf %27, %28 : vector<2x8xf32>
    %30 = arith.addf %24, %29 : vector<2x8xf32>
    %cst_11 = arith.constant dense<0xFF800000> : vector<2xf32>
    %31 = vector.multi_reduction <maximumf>, %30, %cst_11 [1] : vector<2x8xf32> to vector<2xf32>
    %32 = vector.shape_cast %31 : vector<2xf32> to vector<2x1xf32>
    %33 = vector.broadcast %32 : vector<2x1xf32> to vector<2x8xf32>
    %34 = arith.subf %30, %33 : vector<2x8xf32>
    %35 = math.exp %34 : vector<2x8xf32>
    %cst_12 = arith.constant dense<0.000000e+00> : vector<2xf32>
    %36 = vector.multi_reduction <add>, %35, %cst_12 [1] : vector<2x8xf32> to vector<2xf32>
    %37 = vector.shape_cast %36 : vector<2xf32> to vector<2x1xf32>
    %38 = tpu.reciprocal %37 {approx = true} : vector<2x1xf32> -> vector<2x1xf32>
    %39 = vector.broadcast %38 : vector<2x1xf32> to vector<2x8xf32>
    %40 = arith.mulf %35, %39 : vector<2x8xf32>
    %41 = vector.shape_cast %40 : vector<2x8xf32> to vector<2x8x1xf32>
    %42 = vector.broadcast %41 : vector<2x8x1xf32> to vector<2x8x128xf32>
    %43 = arith.mulf %42, %21 : vector<2x8x128xf32>
    %cst_13 = arith.constant dense<0.000000e+00> : vector<2x128xf32>
    %44 = vector.multi_reduction <add>, %43, %cst_13 [1] : vector<2x8x128xf32> to vector<2x128xf32>
    %45 = arith.truncf %44 : vector<2x128xf32> to vector<2x128xbf16>
    %c0_14 = arith.constant 0 : index
    %c384 = arith.constant 384 : index
    %46 = vector.load %arg2[%c0_14, %c384] : memref<128x512xbf16, #tpu.memory_space<vmem>>, vector<128x128xbf16>
    %cst_15 = arith.constant dense<0.000000e+00> : vector<2x128xf32>
    %47 = tpu.matmul %45, %46, %cst_15 {dimension_numbers = #tpu.dot_dimension_numbers<[1], [0], [0], [1], [0, 0, 1, 1], [], []>} : vector<2x128xbf16>, vector<128x128xbf16>, vector<2x128xf32> -> vector<2x128xf32>
    %48 = vector.extract_strided_slice %1 {offsets = [3, 0], sizes = [1, 128], strides = [1, 1]} : vector<16x128xf32> to vector<1x128xf32>
    %49 = vector.broadcast %48 : vector<1x128xf32> to vector<2x128xf32>
    %50 = arith.addf %47, %49 : vector<2x128xf32>
    %51 = vector.extract_strided_slice %0 {offsets = [0, 0, 0], sizes = [2, 1, 128], strides = [1, 1, 1]} : vector<2x8x128xf32> to vector<2x1x128xf32>
    %52 = vector.shape_cast %51 : vector<2x1x128xf32> to vector<2x128xf32>
    %53 = arith.addf %52, %50 : vector<2x128xf32>
    %54 = vector.extract_strided_slice %1 {offsets = [4, 0], sizes = [1, 128], strides = [1, 1]} : vector<16x128xf32> to vector<1x128xf32>
    %55 = vector.extract_strided_slice %1 {offsets = [5, 0], sizes = [1, 128], strides = [1, 1]} : vector<16x128xf32> to vector<1x128xf32>
    %cst_16 = arith.constant dense<0.000000e+00> : vector<2xf32>
    %56 = vector.multi_reduction <add>, %53, %cst_16 [1] : vector<2x128xf32> to vector<2xf32>
    %57 = vector.shape_cast %56 : vector<2xf32> to vector<2x1xf32>
    %cst_17 = arith.constant 1.280000e+02 : f32
    %58 = vector.broadcast %cst_17 : f32 to vector<2x1xf32>
    %59 = arith.divf %57, %58 : vector<2x1xf32>
    %60 = vector.broadcast %59 : vector<2x1xf32> to vector<2x128xf32>
    %61 = arith.subf %53, %60 : vector<2x128xf32>
    %62 = arith.mulf %61, %61 : vector<2x128xf32>
    %cst_18 = arith.constant dense<0.000000e+00> : vector<2xf32>
    %63 = vector.multi_reduction <add>, %62, %cst_18 [1] : vector<2x128xf32> to vector<2xf32>
    %64 = vector.shape_cast %63 : vector<2xf32> to vector<2x1xf32>
    %cst_19 = arith.constant 1.280000e+02 : f32
    %65 = vector.broadcast %cst_19 : f32 to vector<2x1xf32>
    %66 = arith.divf %64, %65 : vector<2x1xf32>
    %67 = vector.broadcast %59 : vector<2x1xf32> to vector<2x128xf32>
    %68 = arith.subf %53, %67 : vector<2x128xf32>
    %cst_20 = arith.constant 9.99999996E-13 : f32
    %69 = vector.broadcast %cst_20 : f32 to vector<2x1xf32>
    %70 = arith.addf %66, %69 : vector<2x1xf32>
    %71 = math.rsqrt %70 : vector<2x1xf32>
    %72 = vector.broadcast %71 : vector<2x1xf32> to vector<2x128xf32>
    %73 = arith.mulf %68, %72 : vector<2x128xf32>
    %74 = vector.broadcast %54 : vector<1x128xf32> to vector<2x128xf32>
    %75 = arith.mulf %73, %74 : vector<2x128xf32>
    %76 = vector.broadcast %55 : vector<1x128xf32> to vector<2x128xf32>
    %77 = arith.addf %75, %76 : vector<2x128xf32>
    %78 = arith.truncf %77 : vector<2x128xf32> to vector<2x128xbf16>
    %c0_21 = arith.constant 0 : index
    %c0_22 = arith.constant 0 : index
    %79 = vector.load %arg4[%c0_21, %c0_22] : memref<128x512xbf16, #tpu.memory_space<vmem>>, vector<128x512xbf16>
    %cst_23 = arith.constant dense<0.000000e+00> : vector<2x512xf32>
    %80 = tpu.matmul %78, %79, %cst_23 {dimension_numbers = #tpu.dot_dimension_numbers<[1], [0], [0], [1], [0, 0, 1, 1], [], []>} : vector<2x128xbf16>, vector<128x512xbf16>, vector<2x512xf32> -> vector<2x512xf32>
    %c0_24 = arith.constant 0 : index
    %c0_25 = arith.constant 0 : index
    %81 = vector.load %arg5[%c0_24, %c0_25] : memref<1x512xf32, #tpu.memory_space<vmem>>, vector<1x512xf32>
    %82 = vector.broadcast %81 : vector<1x512xf32> to vector<2x512xf32>
    %83 = arith.addf %80, %82 : vector<2x512xf32>
    %84 = arith.mulf %83, %83 : vector<2x512xf32>
    %85 = arith.mulf %83, %84 : vector<2x512xf32>
    %cst_26 = arith.constant 4.471500e-02 : f32
    %86 = vector.broadcast %cst_26 : f32 to vector<2x512xf32>
    %87 = arith.mulf %86, %85 : vector<2x512xf32>
    %88 = arith.addf %83, %87 : vector<2x512xf32>
    %cst_27 = arith.constant 0.797884583 : f32
    %89 = vector.broadcast %cst_27 : f32 to vector<2x512xf32>
    %90 = arith.mulf %89, %88 : vector<2x512xf32>
    %91 = math.tanh %90 : vector<2x512xf32>
    %cst_28 = arith.constant 1.000000e+00 : f32
    %92 = vector.broadcast %cst_28 : f32 to vector<2x512xf32>
    %93 = arith.addf %92, %91 : vector<2x512xf32>
    %cst_29 = arith.constant 5.000000e-01 : f32
    %94 = vector.broadcast %cst_29 : f32 to vector<2x512xf32>
    %95 = arith.mulf %94, %93 : vector<2x512xf32>
    %96 = arith.mulf %83, %95 : vector<2x512xf32>
    %97 = arith.truncf %96 : vector<2x512xf32> to vector<2x512xbf16>
    %c0_30 = arith.constant 0 : index
    %c0_31 = arith.constant 0 : index
    %98 = vector.load %arg6[%c0_30, %c0_31] : memref<512x128xbf16, #tpu.memory_space<vmem>>, vector<512x128xbf16>
    %cst_32 = arith.constant dense<0.000000e+00> : vector<2x128xf32>
    %99 = tpu.matmul %97, %98, %cst_32 {dimension_numbers = #tpu.dot_dimension_numbers<[1], [0], [0], [1], [0, 0, 1, 1], [], []>} : vector<2x512xbf16>, vector<512x128xbf16>, vector<2x128xf32> -> vector<2x128xf32>
    %100 = vector.extract_strided_slice %1 {offsets = [6, 0], sizes = [1, 128], strides = [1, 1]} : vector<16x128xf32> to vector<1x128xf32>
    %101 = vector.broadcast %100 : vector<1x128xf32> to vector<2x128xf32>
    %102 = arith.addf %99, %101 : vector<2x128xf32>
    %103 = arith.addf %77, %102 : vector<2x128xf32>
    %104 = vector.extract_strided_slice %1 {offsets = [7, 0], sizes = [1, 128], strides = [1, 1]} : vector<16x128xf32> to vector<1x128xf32>
    %105 = vector.extract_strided_slice %1 {offsets = [8, 0], sizes = [1, 128], strides = [1, 1]} : vector<16x128xf32> to vector<1x128xf32>
    %cst_33 = arith.constant dense<0.000000e+00> : vector<2xf32>
    %106 = vector.multi_reduction <add>, %103, %cst_33 [1] : vector<2x128xf32> to vector<2xf32>
    %107 = vector.shape_cast %106 : vector<2xf32> to vector<2x1xf32>
    %cst_34 = arith.constant 1.280000e+02 : f32
    %108 = vector.broadcast %cst_34 : f32 to vector<2x1xf32>
    %109 = arith.divf %107, %108 : vector<2x1xf32>
    %110 = vector.broadcast %109 : vector<2x1xf32> to vector<2x128xf32>
    %111 = arith.subf %103, %110 : vector<2x128xf32>
    %112 = arith.mulf %111, %111 : vector<2x128xf32>
    %cst_35 = arith.constant dense<0.000000e+00> : vector<2xf32>
    %113 = vector.multi_reduction <add>, %112, %cst_35 [1] : vector<2x128xf32> to vector<2xf32>
    %114 = vector.shape_cast %113 : vector<2xf32> to vector<2x1xf32>
    %cst_36 = arith.constant 1.280000e+02 : f32
    %115 = vector.broadcast %cst_36 : f32 to vector<2x1xf32>
    %116 = arith.divf %114, %115 : vector<2x1xf32>
    %117 = vector.broadcast %109 : vector<2x1xf32> to vector<2x128xf32>
    %118 = arith.subf %103, %117 : vector<2x128xf32>
    %cst_37 = arith.constant 9.99999996E-13 : f32
    %119 = vector.broadcast %cst_37 : f32 to vector<2x1xf32>
    %120 = arith.addf %116, %119 : vector<2x1xf32>
    %121 = math.rsqrt %120 : vector<2x1xf32>
    %122 = vector.broadcast %121 : vector<2x1xf32> to vector<2x128xf32>
    %123 = arith.mulf %118, %122 : vector<2x128xf32>
    %124 = vector.broadcast %104 : vector<1x128xf32> to vector<2x128xf32>
    %125 = arith.mulf %123, %124 : vector<2x128xf32>
    %126 = vector.broadcast %105 : vector<1x128xf32> to vector<2x128xf32>
    %127 = arith.addf %125, %126 : vector<2x128xf32>
    %c0_38 = arith.constant 0 : index
    %c0_39 = arith.constant 0 : index
    %128 = vector.load %arg7[%c0_38, %c0_39] : memref<2x128xf32, #tpu.memory_space<vmem>>, vector<2x128xf32>
    tpu.vector_store %arg7[%c0_38, %c0_39], %127 {strides = array<i32>} : memref<2x128xf32, #tpu.memory_space<vmem>>, vector<2x128xf32>,
    return
  }
}

</mosaic_0001>

<bundles_post_ra>
// kernel: gloss_encoder3_forward.1
= control target key start
LH: loop header
LB: loop body
LE: loop exit
PB: predicated region body
PF: predicated region fallthrough
CT: control target
= control target key end

     0   :  { %12 = vsyncpa [#allocation3], 0  ;;  %s2032_s0 = inlined_call_operand.vmem [shape: f32[2,8,128], index: 0, kind: input, shape index: {}]   ;;  %s2033_s1 = inlined_call_operand.vmem [shape: f32[2,8], index: 1, kind: input, shape index: {}]   ;;  %s2034_s2 = inlined_call_operand.hbm [shape: bf16[128,512], index: 2, kind: input, shape index: {}]   ;;  %s2035_s3 = inlined_call_operand.vmem [shape: f32[16,128], index: 3, kind: input, shape index: {}]   ;;  %s2036_s4 = inlined_call_operand.hbm [shape: bf16[128,512], index: 4, kind: input, shape index: {}]   ;;  %s2037_s5 = inlined_call_operand.vmem [shape: f32[1,512], index: 5, kind: input, shape index: {}]   ;;  %s2038_s6 = inlined_call_operand.hbm [shape: bf16[512,128], index: 6, kind: input, shape index: {}]   ;;  %s2039_s7 = inlined_call_operand.hbm [shape: f32[2,128], index: 7, kind: output, shape index: {}]  }
   0x1   :  { %13 = vsyncpa [#allocation6], 0 }
   0x2   :  { %14 = vsyncpa [#allocation4], 0  ;;  %s1835_s24 = smov [#allocation5]   ;;  %s1836_s26 = smov [#allocation2]  }
   0x3   :  { %s38_s25 = sshll.u32 %s1835_s24, 4  ;;  %s24_s27 = sshll.u32 %s1836_s26, 4  ;;  %s39_s25 = int_to_ptr.vmem [resolvable:$true] %s38_s25  ;;  %s25_s27 = int_to_ptr.vmem [resolvable:$true] %s24_s27 }
   0x4   :  { %s1757_s28 = scalar_lea.vmem %s39_s25, 4096  ;;  %p1762_p1 = scmp.lt.s32.totalorder %s39_s25, %s39_s25 }
   0x5   :  { %p1758_p0 = scmp.ne.s32.totalorder %s39_s25, %s1757_s28  ;;  %p1763_p2 = scmp.lt.s32.totalorder %s1757_s28, %s1757_s28 }
   0x7   :  { %p1764_p3 = por %p1763_p2, %p1762_p1 }
   0x9   :  { %p1765_p4 = pnand %p1764_p3, %p1758_p0 }
   0xb   :  { %1768 = shalt.err (!%p1765_p4)
}
   0xc   :  { %s1837_s29 = smov 256   ;;  %s1838_s30 = smov 16  }
   0xd   :  { %44 = dma.hbm_to_vmem [thread:$0]  %s2036_s4, 4096, %s39_s25, [#allocation6], %s1837_s29, %s1837_s29, %s1838_s30  }
   0xe   :  { %s1777_s10 = scalar_lea.vmem %s25_s27, 4096  ;;  %p1782_p6 = scmp.lt.s32.totalorder %s25_s27, %s25_s27 }
   0xf   :  { %p1778_p5 = scmp.ne.s32.totalorder %s25_s27, %s1777_s10  ;;  %p1783_p7 = scmp.lt.s32.totalorder %s1777_s10, %s1777_s10 }
  0x11   :  { %p1784_p8 = por %p1783_p7, %p1782_p6 }
  0x13   :  { %p1785_p9 = pnand %p1784_p8, %p1778_p5 }
  0x15   :  { %1788 = shalt.err (!%p1785_p9)
}
  0x16   :  { %30 = dma.hbm_to_vmem [thread:$0]  %s2034_s2, 4096, %s25_s27, [#allocation3], %s1837_s29, %s1837_s29, %s1838_s30  }
  0x17   :  { %s1839_s13 = smov [#allocation7]  }
  0x18   :  { %s52_s14 = sshll.u32 %s1839_s13, 4  ;;  %s53_s14 = int_to_ptr.vmem [resolvable:$true] %s52_s14 }
  0x19   :  { %s1797_s15 = scalar_lea.vmem %s53_s14, 4096  ;;  %p1802_p11 = scmp.lt.s32.totalorder %s53_s14, %s53_s14 }
  0x1a   :  { %p1798_p10 = scmp.ne.s32.totalorder %s53_s14, %s1797_s15  ;;  %p1803_p12 = scmp.lt.s32.totalorder %s1797_s15, %s1797_s15 }
  0x1c   :  { %p1804_p13 = por %p1803_p12, %p1802_p11 }
  0x1e   :  { %p1805_p0 = pnand %p1804_p13, %p1798_p10 }
  0x20   :  { %1808 = shalt.err (!%p1805_p0)
}
  0x21   :  { %s1840_s4 = smov 64   ;;  %s1841_s16 = smov 4  }
  0x22   :  { %58 = dma.hbm_to_vmem [thread:$0]  %s2038_s6, 4096, %s53_s14, [#allocation6], %s1840_s4, %s1840_s4, %s1841_s16  }
  0x23   :  { %1829 = dma.done.wait [#allocation3], 4096  }
  0x24   :  { %1830 = vsyncadd [#allocation3], 4294963200 }
  0x25   :  { %1831 = dma.done.wait [#allocation6], 8192  }
  0x26   :  { %1832 = vsyncadd [#allocation6], 4294959104  ;;  %v1842_v0 = vmov 0   ;;  %v1611_v1 = vld [vmem:[#allocation2 + $0xe4] ss:$16 sps:$4 sm:$0xff]   ;;  %v1906_v18 = vld [vmem:[%s2032_s0 + $0x8] sm:$0xff]  ;;  %v320_v20 = vlaneseq }
  0x27   :  { %266 = vmatprep.mubr.bf16.mxu0 %v1842_v0  ;;  %1609 = vset.pattern.permute.xlu0 %v1842_v0  ;;  %v1613_v2 = vld [vmem:[#allocation2 + $0xe0] ss:$16 sps:$4 sm:$0xff]   ;;  %v1614_v3 = vld [vmem:[#allocation2 + $0xc4] ss:$16 sps:$4 sm:$0xff]   ;;  %vm386_vm0 = vcmask 1041409   ;;  %vm389_vm1 = vcmask 58368  }
  0x28   :  { %1610 = vset.pattern.permute.xlu1 %v1842_v0  ;;  %234 = vmatprep.subr.bf16.mxu0 %v1611_v1  ;;  %v1616_v4 = vld [vmem:[#allocation2 + $0xc0] ss:$16 sps:$4 sm:$0xff]   ;;  %v1617_v5 = vld [vmem:[#allocation2 + $0xa4] ss:$16 sps:$4 sm:$0xff]   ;;  %v1916_v22 = vshrl.u32 %v320_v20, 7  ;;  %v377_v49 = vand.u32 127, %v320_v20 }
  0x29   :  { %235 = vmatpush1.bf16.msra.mxu0 %v1613_v2  ;;  %v1619_v6 = vld [vmem:[#allocation2 + $0xa0] ss:$16 sps:$4 sm:$0xff]   ;;  %v1620_v7 = vld [vmem:[#allocation2 + $0x84] ss:$16 sps:$4 sm:$0xff]   ;;  %vm1844_vm2 = vmmov 0   ;;  %vm597_vm3 = vcmask 1041408  }
  0x2a   :  { %236 = vmatprep.subr.bf16.mxu0 %v1614_v3  ;;  %v1622_v8 = vld [vmem:[#allocation2 + $0x80] ss:$16 sps:$4 sm:$0xff]   ;;  %v1623_v9 = vld [vmem:[#allocation2 + $0x64] ss:$16 sps:$4 sm:$0xff]   ;;  %v1919_v24 = vsub.s32 0, %v1916_v22  ;;  %v1922_v26 = vsub.s32 1, %v1916_v22  ;;  %v380_v50 = vsub.s32 %v377_v49, %v1916_v22 }
  0x2b   :  { %v1625_v10 = vld [vmem:[#allocation2 + $0x60] ss:$16 sps:$4 sm:$0xff]   ;;  %v1626_v11 = vld [vmem:[#allocation2 + $0x44] ss:$16 sps:$4 sm:$0xff]   ;;  %v1635_v3 = vld [vmem:[#allocation2 + $0xe8] ss:$16 sps:$4 sm:$0xff]  }
  0x2c   :  { %v1628_v12 = vld [vmem:[#allocation2 + $0x40] ss:$16 sps:$4 sm:$0xff]   ;;  %v1629_v13 = vld [vmem:[#allocation2 + $0x24] ss:$16 sps:$4 sm:$0xff]   ;;  %s1845_s26 = smov [#allocation8]  }
  0x2d   :  { %237 = vmatpush1.bf16.msra.mxu0 %v1616_v4  ;;  %v1631_v14 = vld [vmem:[#allocation2 + $0x20] ss:$16 sps:$4 sm:$0xff]   ;;  %v1632_v15 = vld [vmem:[#allocation2 + $0x4] ss:$16 sps:$4 sm:$0xff]   ;;  %v1843_v4 = vmov 0.0   ;;  %s1390_s27 = sshll.u32 %s1845_s26, 4  ;;  %s1391_s27 = int_to_ptr.vmem [resolvable:$true] %s1390_s27 }
  0x2e   :  { %238 = vmatprep.subr.bf16.mxu0 %v1617_v5  ;;  %v1634_v16 = vld [vmem:[#allocation2] ss:$16 sps:$4 sm:$0xff]   ;;  %1558 = vmatprep.subr.bf16.mxu1 %v1843_v4  ;;  %v1636_v5 = vld [vmem:[#allocation2 + $0xc8] ss:$16 sps:$4 sm:$0xff]   ;;  %s1809_s28 = scalar_lea.vmem %s1391_s27, 32  ;;  %p1814_p2 = scmp.lt.s32.totalorder %s1391_s27, %s1391_s27 }
  0x2f   :  { %v1901_v17 = vld [vmem:[%s2032_s0] sm:$0xff]  ;;  %1574 = vmatprep.mubr.msk.bf16.mxu1 %vm1844_vm2, %v1843_v4  ;;  %1559 = vmatpush3.bf16.msra.mxu1 %v1635_v3  ;;  %p1810_p1 = scmp.ne.s32.totalorder %s1391_s27, %s1809_s28  ;;  %p1815_p3 = scmp.lt.s32.totalorder %s1809_s28, %s1809_s28 }
  0x30   :  { %v1910_v19 = vpack.c.bf16 %v1906_v18, %v1901_v17  ;;  %v346_v21 = vld [vmem:[%s2033_s1] sm:$0x3]  ;;  %1560 = vmatprep.subr.bf16.mxu1 %v1843_v4 }
  0x31   :  { %239 = vmatpush1.bf16.msra.mxu0 %v1619_v6  ;;  %v347_v23 = vsub.f32 1.0, %v346_v21  ;;  %v1929_v29 = vld [vmem:[%s2035_s3] sm:$0xff]  ;;  %v1637_v6 = vld [vmem:[#allocation2 + $0xa8] ss:$16 sps:$4 sm:$0xff]   ;;  %v1643_v21 = vld [vmem:[#allocation2 + $0xec] ss:$16 sps:$4 sm:$0xff]   ;;  %p1816_p4 = por %p1815_p3, %p1814_p2 }
  0x32   :  { %240 = vmatprep.subr.bf16.mxu0 %v1620_v7  ;;  %v323_v30 = vrot.slane %v1929_v29, %v1922_v26  ;;  %v1638_v7 = vld [vmem:[#allocation2 + $0x88] ss:$16 sps:$4 sm:$0xff]  }
  0x33   :  { %v348_v25 = vmul.f32 -1e+09, %v347_v23  ;;  %1561 = vmatpush3.bf16.msra.mxu1 %v1636_v5  ;;  %v1644_v23 = vld [vmem:[#allocation2 + $0xcc] ss:$16 sps:$4 sm:$0xff]   ;;  %v489_v5 = vsub.s32 3, %v1916_v22  ;;  %p1817_p5 = pnand %p1816_p4, %p1810_p1 }
  0x34   :  { %1562 = vmatprep.subr.bf16.mxu1 %v1843_v4 }
  0x35   :  { %241 = vmatpush1.bf16.msra.mxu0 %v1622_v8  ;;  %v353_v27 = vrot.slane %v348_v25, %v1919_v24  ;;  %v360_v28 = vrot.slane %v348_v25, %v1922_v26  ;;  %v1639_v8 = vld [vmem:[#allocation2 + $0x68] ss:$16 sps:$4 sm:$0xff]  }
  0x36   :  { %242 = vmatprep.subr.bf16.mxu0 %v1623_v9  ;;  %v1640_v9 = vld [vmem:[#allocation2 + $0x48] ss:$16 sps:$4 sm:$0xff]  }
  0x37   :  { %355 = vbcast.lane.b32.xlu1 %v353_v27, 256  ;;  %1563 = vmatpush3.bf16.msra.mxu1 %v1637_v6  ;;  %v490_v6 = vrot.slane %v1929_v29, %v489_v5 }
  0x38   :  { %1564 = vmatprep.subr.bf16.mxu1 %v1843_v4 }
  0x39   :  { %243 = vmatpush1.bf16.msra.mxu0 %v1625_v10  ;;  %v1641_v10 = vld [vmem:[#allocation2 + $0x28] ss:$16 sps:$4 sm:$0xff]  }
  0x3a   :  { %244 = vmatprep.subr.bf16.mxu0 %v1626_v11  ;;  %v1642_v11 = vld [vmem:[#allocation2 + $0x8] ss:$16 sps:$4 sm:$0xff]  }
  0x3b   :  { %362 = vbcast.lane.b32.xlu1 %v360_v28, 256  ;;  %1565 = vmatpush3.bf16.msra.mxu1 %v1638_v7 }
  0x3c   :  { %1566 = vmatprep.subr.bf16.mxu1 %v1843_v4 }
  0x3d   :  { %245 = vmatpush1.bf16.msra.mxu0 %v1628_v12 }
  0x3e   :  { %246 = vmatprep.subr.bf16.mxu0 %v1629_v13 }
  0x3f   :  { %1567 = vmatpush3.bf16.msra.mxu1 %v1639_v8 }
  0x40   :  { %1568 = vmatprep.subr.bf16.mxu1 %v1843_v4 }
  0x41   :  { %247 = vmatpush1.bf16.msra.mxu0 %v1631_v14 }
  0x42   :  { %248 = vmatprep.subr.bf16.mxu0 %v1632_v15 }
  0x43   :  { %1569 = vmatpush3.bf16.msra.mxu1 %v1640_v9 }
  0x44   :  { %1570 = vmatprep.subr.bf16.mxu1 %v1843_v4 }
  0x45   :  { %249 = vmatpush1.bf16.msra.mxu0 %v1634_v16 }
  0x46   :  { %1578 = vmatprep.subr.bf16.mxu0 %v1843_v4 }
  0x47   :  { %1571 = vmatpush3.bf16.msra.mxu1 %v1641_v10 }
  0x48   :  { %267 = vmatmul.mubr.bf16.vlgmr.msra.gmra.mxu0 %v1910_v19  ;;  %1572 = vmatprep.subr.bf16.mxu1 %v1843_v4 }
  0x49   :  { %1594 = vmatprep.mubr.msk.bf16.mxu0 %vm1844_vm2, %v1843_v4  ;;  %1579 = vmatpush3.bf16.msra.mxu0 %v1643_v21 }
  0x4a   :  { %1580 = vmatprep.subr.bf16.mxu0 %v1843_v4 }
  0x4b   :  { %1573 = vmatpush3.bf16.msra.mxu1 %v1642_v11 }
  0x4d   :  { %1581 = vmatpush3.bf16.msra.mxu0 %v1644_v23 }
  0x4e   :  { %1575 = vmatmul.mubr.bf16.vlgmr.msra.gmra.mxu1 %v1910_v19  ;;  %1582 = vmatprep.subr.bf16.mxu0 %v1843_v4 }
  0x4f   :  { %896 = vmatprep.mubr.bf16.mxu1 %v1842_v0 }
  0xa9   :  { %v356_v43 = vpop.permute.xlu1 %355 }
  0xad   :  { %v363_v46 = vpop.permute.xlu1 %362 }
 0x108   :  { %v268_v31 = vpop.f32.mrf.mxu0 }
 0x109   :  { %v318_v32 = vadd.f32 %v268_v31, %v1929_v29 }
 0x10a   :  { %v270_v33 = vpop.f32.mrf.mxu0 }
 0x10b   :  { %v324_v34 = vadd.f32 %v323_v30, %v270_v33  ;;  %v335_v35 = vrot.slane %v318_v32, %v1919_v24  ;;  %v1645_v33 = vld [vmem:[#allocation2 + $0xac] ss:$16 sps:$4 sm:$0xff]  }
 0x10c   :  { %v272_v36 = vpop.f32.mrf.mxu0  ;;  %1583 = vmatpush3.bf16.msra.mxu0 %v1645_v33  ;;  %v1651_v33 = vld [vmem:[#allocation5 + $0xe0] ss:$16 sps:$4 sm:$0xff]  }
 0x10d   :  { %v319_v37 = vadd.f32 %v272_v36, %v1929_v29  ;;  %v340_v38 = vmul.f32 %v335_v35, %v324_v34  ;;  %1584 = vmatprep.subr.bf16.mxu0 %v1843_v4  ;;  %v1646_v36 = vld [vmem:[#allocation2 + $0x8c] ss:$16 sps:$4 sm:$0xff]  }
 0x10e   :  { %v274_v39 = vpop.f32.mrf.mxu0  ;;  %v311_v19 = vpop.f32.mrf.mxu1 }
 0x10f   :  { %v339_v40 = vrot.slane %v319_v37, %v1919_v24  ;;  %v325_v41 = vadd.f32 %v323_v30, %v274_v39  ;;  %342 = vadd.xlane.f32.xlu0 %v340_v38  ;;  %v1647_v38 = vld [vmem:[#allocation2 + $0x6c] ss:$16 sps:$4 sm:$0xff]  }
 0x110   :  { %v1576_v25 = vpop.f32.mrf.mxu1  ;;  %1585 = vmatpush3.bf16.msra.mxu0 %v1646_v36  ;;  %v1648_v39 = vld [vmem:[#allocation2 + $0x4c] ss:$16 sps:$4 sm:$0xff]  }
 0x111   :  { %v341_v42 = vmul.f32 %v339_v40, %v325_v41  ;;  %1586 = vmatprep.subr.bf16.mxu0 %v1843_v4  ;;  %v1649_v40 = vld [vmem:[#allocation2 + $0x2c] ss:$16 sps:$4 sm:$0xff]  }
 0x112   :  { %v314_v27 = vpop.f32.mrf.mxu1  ;;  %v1650_v41 = vld [vmem:[#allocation2 + $0xc] ss:$16 sps:$4 sm:$0xff]  }
 0x113   :  { %344 = vadd.xlane.f32.xlu0 %v341_v42  ;;  %v328_v42 = vsub.s32 2, %v1916_v22  ;;  %v1662_v36 = vld [vmem:[#allocation5 + $0xcc] ss:$16 sps:$4 sm:$0xff]  }
 0x114   :  { %v1577_v28 = vpop.f32.mrf.mxu1  ;;  %1587 = vmatpush3.bf16.msra.mxu0 %v1647_v38  ;;  %v1660_v38 = vld [vmem:[#allocation5 + $0xc8] ss:$16 sps:$4 sm:$0xff]  }
 0x115   :  { %1588 = vmatprep.subr.bf16.mxu0 %v1843_v4 }
 0x118   :  { %1589 = vmatpush3.bf16.msra.mxu0 %v1648_v39  ;;  %v1665_v39 = vld [vmem:[#allocation5 + $0xa4] ss:$16 sps:$4 sm:$0xff]  }
 0x119   :  { %1590 = vmatprep.subr.bf16.mxu0 %v1843_v4 }
 0x11c   :  { %1591 = vmatpush3.bf16.msra.mxu0 %v1649_v40  ;;  %v1668_v40 = vld [vmem:[#allocation5 + $0xac] ss:$16 sps:$4 sm:$0xff]  }
 0x11d   :  { %1592 = vmatprep.subr.bf16.mxu0 %v1843_v4 }
 0x120   :  { %1593 = vmatpush3.bf16.msra.mxu0 %v1650_v41  ;;  %v1663_v41 = vld [vmem:[#allocation5 + $0xa0] ss:$16 sps:$4 sm:$0xff]  }
 0x198   :  { %v343_v44 = vpop.xlane.xlu0 %342 }
 0x199   :  { %v366_v45 = vadd.f32 %v356_v43, %v343_v44  ;;  %v329_v43 = vrot.slane %v1929_v29, %v328_v42 }
 0x19b   :  { %371 = vperm.xlu0 %1609, %v366_v45   ;;  %v330_v44 = vadd.f32 %v329_v43, %v311_v19 }
 0x19c   :  { %v345_v47 = vpop.xlane.xlu0 %344 }
 0x19d   :  { %v367_v48 = vadd.f32 %v363_v46, %v345_v47  ;;  %v331_v47 = vadd.f32 %v329_v43, %v314_v27  ;;  %v1666_v43 = vld [vmem:[#allocation5 + $0xa8] ss:$16 sps:$4 sm:$0xff]  }
 0x19f   :  { %374 = vperm.xlu1 %1610, %v367_v48  }
 0x216   :  { %v372_v51 = vpop.permute.xlu0 %371 }
 0x217   :  { %v381_v53 = vrot.slane %v372_v51, %v380_v50 }
 0x21a   :  { %v375_v52 = vpop.permute.xlu1 %374 }
 0x21b   :  { %v385_v54 = vrot.slane %v375_v52, %v380_v50 }
 0x21d   :  { %v387_v55 = vsel %vm386_vm0, %v385_v54, %v381_v53 }
 0x21e   :  { %v390_v56 = vsel %vm389_vm1, %v387_v55, -inf }
 0x21f   :  { %391 = vmax.xlane.f32.xlu1 %v390_v56 }
 0x2a8   :  { %v392_v57 = vpop.xlane.xlu1 %391 }
 0x2a9   :  { %v397_v58 = vrot.slane %v392_v57, %v1919_v24  ;;  %v401_v59 = vrot.slane %v392_v57, %v1922_v26 }
 0x2ab   :  { %v404_v60 = vsub.f32 %v366_v45, %v397_v58  ;;  %v405_v61 = vsub.f32 %v367_v48, %v401_v59 }
 0x2ad   :  { %v406_v62 = vmul.f32 1.442695, %v404_v60  ;;  %v408_v63 = vmul.f32 1.442695, %v405_v61 }
 0x2af   :  { %1731 = vpow2.f32 %v406_v62 }
 0x2b0   :  { %1733 = vpow2.f32 %v408_v63 }
 0x2bc   :  { %v1732_v1 = vpop.eup %1731 }
 0x2bd   :  { %v1734_v2 = vpop.eup %1733  ;;  %413 = vperm.xlu1 %1610, %v1732_v1  }
 0x2be   :  { %416 = vperm.xlu0 %1609, %v1734_v2  }
 0x338   :  { %v414_v12 = vpop.permute.xlu1 %413 }
 0x339   :  { %v417_v13 = vpop.permute.xlu0 %416  ;;  %v421_v14 = vrot.slane %v414_v12, %v380_v50 }
 0x33a   :  { %v425_v15 = vrot.slane %v417_v13, %v380_v50 }
 0x33c   :  { %v426_v16 = vsel %vm386_vm0, %v425_v15, %v421_v14 }
 0x33d   :  { %v428_v20 = vsel %vm389_vm1, %v426_v16, 0.0 }
 0x33e   :  { %429 = vadd.xlane.f32.xlu0 %v428_v20 }
 0x3c7   :  { %v430_v30 = vpop.xlane.xlu0 %429 }
 0x3c8   :  { %1735 = vrcp.f32 %v430_v30 }
 0x3d5   :  { %v1736_v31 = vpop.eup %1735 }
 0x3d6   :  { %v436_v32 = vrot.slane %v1736_v31, %v1919_v24  ;;  %v440_v35 = vrot.slane %v1736_v31, %v1922_v26  ;;  %v1653_v31 = vld [vmem:[#allocation5 + $0xe4] ss:$16 sps:$4 sm:$0xff]  }
 0x3d7   :  { %864 = vmatprep.subr.bf16.mxu1 %v1653_v31  ;;  %v1703_v31 = vld [vmem:[#allocation7 + $0x70] sm:$0xff]  }
 0x3d8   :  { %v443_v34 = vmul.f32 %v1732_v1, %v436_v32  ;;  %v444_v37 = vmul.f32 %v1734_v2, %v440_v35  ;;  %v1656_v32 = vld [vmem:[#allocation5 + $0xec] ss:$16 sps:$4 sm:$0xff]   ;;  %865 = vmatpush1.bf16.msra.mxu1 %v1651_v33  ;;  %v1659_v35 = vld [vmem:[#allocation5 + $0xc4] ss:$16 sps:$4 sm:$0xff]  }
 0x3d9   :  { %905 = vmatprep.subr.bf16.mxu0 %v1656_v32  ;;  %866 = vmatprep.subr.bf16.mxu1 %v1659_v35  ;;  %v1704_v32 = vld [vmem:[#allocation7 + $0xf0] sm:$0xff]   ;;  %v1707_v35 = vld [vmem:[#allocation7 + $0x68] sm:$0xff]  }
 0x3da   :  { %447 = vperm.xlu1 %1610, %v443_v34   ;;  %v1654_v34 = vld [vmem:[#allocation5 + $0xe8] ss:$16 sps:$4 sm:$0xff]   ;;  %v1705_v33 = vld [vmem:[#allocation7 + $0x30] sm:$0xff]  }
 0x3de   :  { %452 = vperm.xlu1 %1610, %v444_v37   ;;  %v1657_v37 = vld [vmem:[#allocation5 + $0xc0] ss:$16 sps:$4 sm:$0xff]  }
 0x3df   :  { %867 = vmatpush1.bf16.msra.mxu1 %v1657_v37  ;;  %v1709_v37 = vld [vmem:[#allocation7 + $0x28] sm:$0xff]  }
 0x3e0   :  { %868 = vmatprep.subr.bf16.mxu1 %v1665_v39  ;;  %v1711_v39 = vld [vmem:[#allocation7 + $0x60] sm:$0xff]  }
 0x3e3   :  { %869 = vmatpush1.bf16.msra.mxu1 %v1663_v41  ;;  %v1713_v41 = vld [vmem:[#allocation7 + $0x20] sm:$0xff]  }
 0x455   :  { %v448_v45 = vpop.permute.xlu1 %447 }
 0x456   :  { %v455_v46 = vmul.f32 %v448_v45, %v330_v44  ;;  %v1671_v44 = vld [vmem:[#allocation5 + $0x84] ss:$16 sps:$4 sm:$0xff]   ;;  %v1674_v45 = vld [vmem:[#allocation5 + $0x8c] ss:$16 sps:$4 sm:$0xff]  }
 0x457   :  { %870 = vmatprep.subr.bf16.mxu1 %v1671_v44  ;;  %v1715_v44 = vld [vmem:[#allocation7 + $0x58] sm:$0xff]  }
 0x458   :  { %v457_v48 = vrot.slane %v455_v46, 4 }
 0x459   :  { %v453_v49 = vpop.permute.xlu1 %452 }
 0x45a   :  { %v458_v50 = vadd.f32 %v457_v48, %v455_v46  ;;  %v456_v51 = vmul.f32 %v453_v49, %v331_v47  ;;  %v1669_v46 = vld [vmem:[#allocation5 + $0x80] ss:$16 sps:$4 sm:$0xff]   ;;  %v1672_v47 = vld [vmem:[#allocation5 + $0x88] ss:$16 sps:$4 sm:$0xff]   ;;  %v1677_v48 = vld [vmem:[#allocation5 + $0x64] ss:$16 sps:$4 sm:$0xff]  }
 0x45b   :  { %871 = vmatpush1.bf16.msra.mxu1 %v1669_v46  ;;  %v1680_v49 = vld [vmem:[#allocation5 + $0x6c] ss:$16 sps:$4 sm:$0xff]  }
 0x45c   :  { %v459_v52 = vrot.slane %v458_v50, 2  ;;  %v463_v53 = vrot.slane %v456_v51, 4  ;;  %872 = vmatprep.subr.bf16.mxu1 %v1677_v48  ;;  %v1717_v46 = vld [vmem:[#allocation7 + $0x18] sm:$0xff]   ;;  %v1719_v48 = vld [vmem:[#allocation7 + $0x50] sm:$0xff]  }
 0x45e   :  { %v460_v54 = vadd.f32 %v459_v52, %v458_v50  ;;  %v464_v55 = vadd.f32 %v463_v53, %v456_v51  ;;  %v1675_v50 = vld [vmem:[#allocation5 + $0x60] ss:$16 sps:$4 sm:$0xff]   ;;  %v1678_v51 = vld [vmem:[#allocation5 + $0x68] ss:$16 sps:$4 sm:$0xff]   ;;  %v1683_v53 = vld [vmem:[#allocation5 + $0x44] ss:$16 sps:$4 sm:$0xff]  }
 0x45f   :  { %873 = vmatpush1.bf16.msra.mxu1 %v1675_v50  ;;  %v1681_v52 = vld [vmem:[#allocation5 + $0x40] ss:$16 sps:$4 sm:$0xff]  }
 0x460   :  { %v461_v56 = vrot.slane %v460_v54, 1  ;;  %v465_v57 = vrot.slane %v464_v55, 2  ;;  %874 = vmatprep.subr.bf16.mxu1 %v1683_v53  ;;  %v1721_v50 = vld [vmem:[#allocation7 + $0x10] sm:$0xff]   ;;  %v1724_v53 = vld [vmem:[#allocation7 + $0xc8] sm:$0xff]  }
 0x462   :  { %v462_v58 = vadd.f32 %v461_v56, %v460_v54  ;;  %v466_v59 = vadd.f32 %v465_v57, %v464_v55  ;;  %v1684_v54 = vld [vmem:[#allocation5 + $0x48] ss:$16 sps:$4 sm:$0xff]   ;;  %v1686_v55 = vld [vmem:[#allocation5 + $0x4c] ss:$16 sps:$4 sm:$0xff]   ;;  %v1689_v56 = vld [vmem:[#allocation5 + $0x24] ss:$16 sps:$4 sm:$0xff]  }
 0x463   :  { %v1692_v57 = vld [vmem:[#allocation5 + $0x2c] ss:$16 sps:$4 sm:$0xff]   ;;  %875 = vmatpush1.bf16.msra.mxu1 %v1681_v52 }
 0x464   :  { %v467_v60 = vrot.slane %v466_v59, 1  ;;  %v469_v61 = vpack.c.bf16 %v462_v58, %v462_v58  ;;  %v1687_v58 = vld [vmem:[#allocation5 + $0x20] ss:$16 sps:$4 sm:$0xff]   ;;  %876 = vmatprep.subr.bf16.mxu1 %v1689_v56  ;;  %v1723_v52 = vld [vmem:[#allocation7 + $0x48] sm:$0xff]  }
 0x465   :  { %v1727_v56 = vld [vmem:[#allocation7 + $0x40] sm:$0xff]  }
 0x466   :  { %v468_v62 = vadd.f32 %v467_v60, %v466_v59  ;;  %v493_v1 = vunpack.c.l.b16 %v469_v61  ;;  %v1690_v59 = vld [vmem:[#allocation5 + $0x28] ss:$16 sps:$4 sm:$0xff]   ;;  %v1695_v60 = vld [vmem:[#allocation5 + $0x4] ss:$16 sps:$4 sm:$0xff]   ;;  %v1698_v61 = vld [vmem:[#allocation5 + $0xc] ss:$16 sps:$4 sm:$0xff]  }
 0x467   :  { %877 = vmatpush1.bf16.msra.mxu1 %v1687_v58  ;;  %v1729_v58 = vld [vmem:[#allocation7] sm:$0xff]  }
 0x468   :  { %v470_v63 = vpack.c.bf16 %v468_v62, %v468_v62  ;;  %v1693_v62 = vld [vmem:[#allocation5] ss:$16 sps:$4 sm:$0xff]   ;;  %878 = vmatprep.subr.bf16.mxu1 %v1695_v60 }
 0x469   :  { %v674_v60 = vld [vmem:[%s2037_s5] sm:$0xf] }
 0x46a   :  { %v494_v2 = vunpack.c.l.b16 %v470_v63  ;;  %v1696_v63 = vld [vmem:[#allocation5 + $0x8] ss:$16 sps:$4 sm:$0xff]  }
 0x46b   :  { %879 = vmatpush1.bf16.msra.mxu1 %v1693_v62  ;;  %v687_v62 = vrot.slane %v674_v60, %v328_v42 }
 0x46c   :  { %v495_v3 = vsel %vm386_vm0, %v494_v2, %v493_v1 }
 0x46d   :  { %v496_v4 = vpack.c.b16 %v495_v3, %v495_v3 }
 0x46f   :  { %1595 = vmatmul.mubr.bf16.vlgmr.msra.gmra.mxu0 %v496_v4  ;;  %v630_v4 = vsub.s32 4, %v1916_v22 }
 0x470   :  { %937 = vmatprep.mubr.bf16.mxu0 %v1842_v0  ;;  %906 = vmatpush1.bf16.msra.mxu0 %v1654_v34  ;;  %v1706_v34 = vld [vmem:[#allocation7 + $0xb0] sm:$0xff]  }
 0x471   :  { %907 = vmatprep.subr.bf16.mxu0 %v1662_v36  ;;  %v1708_v36 = vld [vmem:[#allocation7 + $0xe8] sm:$0xff]  }
 0x474   :  { %908 = vmatpush1.bf16.msra.mxu0 %v1660_v38  ;;  %v1710_v38 = vld [vmem:[#allocation7 + $0xa8] sm:$0xff]  }
 0x475   :  { %909 = vmatprep.subr.bf16.mxu0 %v1668_v40  ;;  %v1712_v40 = vld [vmem:[#allocation7 + $0xe0] sm:$0xff]  }
 0x478   :  { %910 = vmatpush1.bf16.msra.mxu0 %v1666_v43  ;;  %v1714_v43 = vld [vmem:[#allocation7 + $0xa0] sm:$0xff]  }
 0x479   :  { %911 = vmatprep.subr.bf16.mxu0 %v1674_v45  ;;  %v1716_v45 = vld [vmem:[#allocation7 + $0xd8] sm:$0xff]  }
 0x47c   :  { %912 = vmatpush1.bf16.msra.mxu0 %v1672_v47  ;;  %v1718_v47 = vld [vmem:[#allocation7 + $0x98] sm:$0xff]  }
 0x47d   :  { %913 = vmatprep.subr.bf16.mxu0 %v1680_v49  ;;  %v1720_v49 = vld [vmem:[#allocation7 + $0xd0] sm:$0xff]  }
 0x480   :  { %914 = vmatpush1.bf16.msra.mxu0 %v1678_v51  ;;  %v1722_v51 = vld [vmem:[#allocation7 + $0x90] sm:$0xff]  }
 0x481   :  { %915 = vmatprep.subr.bf16.mxu0 %v1686_v55  ;;  %v1726_v55 = vld [vmem:[#allocation7 + $0x88] sm:$0xff]  }
 0x484   :  { %916 = vmatpush1.bf16.msra.mxu0 %v1684_v54  ;;  %v1725_v54 = vld [vmem:[#allocation7 + $0x8] sm:$0xff]  }
 0x485   :  { %917 = vmatprep.subr.bf16.mxu0 %v1692_v57  ;;  %v1728_v57 = vld [vmem:[#allocation7 + $0xc0] sm:$0xff]  }
 0x488   :  { %918 = vmatpush1.bf16.msra.mxu0 %v1690_v59  ;;  %v1730_v59 = vld [vmem:[#allocation7 + $0x80] sm:$0xff]  }
 0x489   :  { %919 = vmatprep.subr.bf16.mxu0 %v1698_v61  ;;  %v679_v61 = vrot.slane %v674_v60, %v1919_v24 }
 0x48c   :  { %920 = vmatpush1.bf16.msra.mxu0 %v1696_v63  ;;  %v683_v63 = vrot.slane %v674_v60, %v1922_v26 }
 0x52f   :  { %v580_v7 = vpop.f32.mrf.mxu0 }
 0x530   :  { %v581_v8 = vadd.f32 %v580_v7, %v490_v6  ;;  %v636_v6 = vsub.s32 5, %v1916_v22  ;;  %v631_v7 = vrot.slane %v1929_v29, %v630_v4 }
 0x531   :  { %v1596_v9 = vpop.f32.mrf.mxu0 }
 0x532   :  { %v587_v10 = vrot.slane %v581_v8, 1  ;;  %v590_v14 = vadd.f32 %v581_v8, %v1901_v17 }
 0x533   :  { %v583_v11 = vpop.f32.mrf.mxu0 }
 0x534   :  { %v591_v12 = vadd.f32 %v587_v10, %v1906_v18  ;;  %v637_v11 = vrot.slane %v1929_v29, %v636_v6 }
 0x535   :  { %v1597_v13 = vpop.f32.mrf.mxu0 }
 0x536   :  { %v594_v15 = vrot.slane %v591_v12, 7 }
 0x538   :  { %v595_v0 = vsel %vm386_vm0, %v594_v15, %v590_v14 }
 0x539   :  { %v598_v16 = vsel %vm597_vm3, %v595_v0, 0.0 }
 0x53a   :  { %599 = vadd.xlane.f32.xlu1 %v598_v16 }
 0x5c3   :  { %v600_v20 = vpop.xlane.xlu1 %599 }
 0x5c4   :  { %v602_v21 = vmul.f32 0.0078125, %v600_v20 }
 0x5c6   :  { %v604_v23 = vrot.slane %v602_v21, 1  ;;  %v1980_v19 = vsub.f32 %v590_v14, %v602_v21 }
 0x5c8   :  { %v1982_v25 = vsub.f32 %v591_v12, %v604_v23  ;;  %v609_v17 = vmul.f32 %v1980_v19, %v1980_v19 }
 0x5ca   :  { %v610_v18 = vmul.f32 %v1982_v25, %v1982_v25 }
 0x5cc   :  { %v613_v27 = vrot.slane %v610_v18, 7 }
 0x5ce   :  { %v614_v28 = vsel %vm386_vm0, %v613_v27, %v609_v17  ;;  %v1700_v27 = vld [vmem:[#allocation7 + $0xf8] sm:$0xff]  }
 0x5cf   :  { %v616_v30 = vsel %vm597_vm3, %v614_v28, 0.0  ;;  %v1701_v28 = vld [vmem:[#allocation7 + $0x38] sm:$0xff]   ;;  %1536 = vmatprep.subr.bf16.mxu0 %v1700_v27 }
 0x5d0   :  { %617 = vadd.xlane.f32.xlu0 %v616_v30  ;;  %v1702_v30 = vld [vmem:[#allocation7 + $0xb8] sm:$0xff]  }
 0x659   :  { %v618_v1 = vpop.xlane.xlu0 %617 }
 0x65a   :  { %v619_v2 = vmul.f32 0.0078125, %v618_v1  ;;  %v691_v1 = vrot.slane %v674_v60, %v489_v5 }
 0x65c   :  { %v620_v3 = vadd.f32 1e-12, %v619_v2 }
 0x65e   :  { %1737 = vrsqrt.f32 %v620_v3 }
 0x66b   :  { %v1738_v8 = vpop.eup %1737 }
 0x66c   :  { %v623_v9 = vrot.slane %v1738_v8, 1  ;;  %v626_v10 = vmul.f32 %v1738_v8, %v1980_v19 }
 0x66e   :  { %v627_v12 = vmul.f32 %v623_v9, %v1982_v25  ;;  %v632_v13 = vmul.f32 %v631_v7, %v626_v10  ;;  %v1699_v25 = vld [vmem:[#allocation7 + $0x78] sm:$0xff]  }
 0x66f   :  { %1514 = vmatprep.subr.bf16.mxu1 %v1699_v25 }
 0x670   :  { %v633_v14 = vmul.f32 %v631_v7, %v627_v12  ;;  %v1996_v15 = vadd.f32 %v637_v11, %v632_v13 }
 0x672   :  { %v1998_v0 = vadd.f32 %v637_v11, %v633_v14  ;;  %v640_v16 = vpack.c.bf16 %v1996_v15, %v1996_v15 }
 0x674   :  { %v641_v20 = vpack.c.bf16 %v1998_v0, %v1998_v0  ;;  %v698_v23 = vunpack.c.l.b16 %v640_v16 }
 0x676   :  { %v699_v21 = vunpack.c.l.b16 %v641_v20 }
 0x678   :  { %v700_v18 = vrot.slane %v699_v21, 7 }
 0x67a   :  { %v701_v19 = vsel %vm386_vm0, %v700_v18, %v698_v23 }
 0x67b   :  { %v702_v17 = vpack.c.b16 %v701_v19, %v701_v19 }
 0x67d   :  { %897 = vmatmul.mubr.bf16.vlgmr.msra.gmra.mxu1 %v702_v17  ;;  %938 = vmatmul.mubr.bf16.vlgmr.msra.gmra.mxu0 %v702_v17 }
 0x67e   :  { %1515 = vmatpush3.bf16.msra.mxu1 %v1701_v28  ;;  %1537 = vmatpush3.bf16.msra.mxu0 %v1702_v30 }
 0x67f   :  { %1516 = vmatprep.subr.bf16.mxu1 %v1703_v31  ;;  %1538 = vmatprep.subr.bf16.mxu0 %v1704_v32 }
 0x682   :  { %1517 = vmatpush3.bf16.msra.mxu1 %v1705_v33  ;;  %1539 = vmatpush3.bf16.msra.mxu0 %v1706_v34 }
 0x683   :  { %1518 = vmatprep.subr.bf16.mxu1 %v1707_v35  ;;  %1540 = vmatprep.subr.bf16.mxu0 %v1708_v36 }
 0x686   :  { %1519 = vmatpush3.bf16.msra.mxu1 %v1709_v37  ;;  %1541 = vmatpush3.bf16.msra.mxu0 %v1710_v38 }
 0x687   :  { %1520 = vmatprep.subr.bf16.mxu1 %v1711_v39  ;;  %1542 = vmatprep.subr.bf16.mxu0 %v1712_v40 }
 0x68a   :  { %1521 = vmatpush3.bf16.msra.mxu1 %v1713_v41  ;;  %1543 = vmatpush3.bf16.msra.mxu0 %v1714_v43 }
 0x68b   :  { %1522 = vmatprep.subr.bf16.mxu1 %v1715_v44  ;;  %1544 = vmatprep.subr.bf16.mxu0 %v1716_v45 }
 0x68e   :  { %1523 = vmatpush3.bf16.msra.mxu1 %v1717_v46  ;;  %1545 = vmatpush3.bf16.msra.mxu0 %v1718_v47 }
 0x68f   :  { %1524 = vmatprep.subr.bf16.mxu1 %v1719_v48  ;;  %1546 = vmatprep.subr.bf16.mxu0 %v1720_v49 }
 0x692   :  { %1525 = vmatpush3.bf16.msra.mxu1 %v1721_v50  ;;  %1547 = vmatpush3.bf16.msra.mxu0 %v1722_v51 }
 0x693   :  { %1526 = vmatprep.subr.bf16.mxu1 %v1723_v52  ;;  %1548 = vmatprep.subr.bf16.mxu0 %v1724_v53 }
 0x696   :  { %1527 = vmatpush3.bf16.msra.mxu1 %v1725_v54  ;;  %1549 = vmatpush3.bf16.msra.mxu0 %v1726_v55 }
 0x697   :  { %1528 = vmatprep.subr.bf16.mxu1 %v1727_v56  ;;  %1550 = vmatprep.subr.bf16.mxu0 %v1728_v57 }
 0x69a   :  { %1529 = vmatpush3.bf16.msra.mxu1 %v1729_v58  ;;  %1551 = vmatpush3.bf16.msra.mxu0 %v1730_v59  ;;  %v1052_v58 = vsub.s32 6, %v1916_v22 }
 0x73d   :  { %v898_v2 = vpop.f32.mrf.mxu1  ;;  %v939_v3 = vpop.f32.mrf.mxu0 }
 0x73e   :  { %v899_v4 = vadd.f32 %v898_v2, %v679_v61  ;;  %v940_v6 = vadd.f32 %v939_v3, %v687_v62  ;;  %v1053_v61 = vrot.slane %v1929_v29, %v1052_v58 }
 0x73f   :  { %v900_v7 = vpop.f32.mrf.mxu1  ;;  %v941_v8 = vpop.f32.mrf.mxu0 }
 0x740   :  { %v946_v9 = vmul.f32 %v899_v4, %v899_v4  ;;  %v948_v10 = vmul.f32 %v940_v6, %v940_v6  ;;  %v901_v11 = vadd.f32 %v900_v7, %v683_v63  ;;  %v942_v12 = vadd.f32 %v941_v8, %v691_v1 }
 0x741   :  { %v902_v13 = vpop.f32.mrf.mxu1  ;;  %v943_v14 = vpop.f32.mrf.mxu0 }
 0x742   :  { %v950_v16 = vmul.f32 %v946_v9, %v899_v4  ;;  %v952_v20 = vmul.f32 %v948_v10, %v940_v6  ;;  %v947_v42 = vmul.f32 %v901_v11, %v901_v11  ;;  %v949_v21 = vmul.f32 %v942_v12, %v942_v12 }
 0x743   :  { %v903_v26 = vpop.f32.mrf.mxu1  ;;  %v944_v23 = vpop.f32.mrf.mxu0 }
 0x744   :  { %v954_v18 = vmul.f32 0.044715, %v950_v16  ;;  %v956_v5 = vmul.f32 0.044715, %v952_v20  ;;  %v951_v19 = vmul.f32 %v947_v42, %v901_v11  ;;  %v953_v17 = vmul.f32 %v949_v21, %v942_v12 }
 0x746   :  { %v958_v25 = vadd.f32 %v954_v18, %v899_v4  ;;  %v960_v27 = vadd.f32 %v956_v5, %v940_v6  ;;  %v955_v28 = vmul.f32 0.044715, %v951_v19  ;;  %v957_v30 = vmul.f32 0.044715, %v953_v17 }
 0x748   :  { %v962_v31 = vmul.f32 0.7978846, %v958_v25  ;;  %v964_v32 = vmul.f32 0.7978846, %v960_v27  ;;  %v959_v33 = vadd.f32 %v955_v28, %v901_v11  ;;  %v961_v34 = vadd.f32 %v957_v30, %v942_v12 }
 0x749   :  { %v1368_v28 = vsub.s32 7, %v1916_v22 }
 0x74a   :  { %1739 = vtanh.f32 %v962_v31  ;;  %v963_v35 = vmul.f32 0.7978846, %v959_v33  ;;  %v965_v36 = vmul.f32 0.7978846, %v961_v34  ;;  %v72_v34 = vld [vmem:[%s2035_s3 + $0x8] sm:$0xff] }
 0x74b   :  { %1741 = vtanh.f32 %v964_v32  ;;  %v1369_v33 = vrot.slane %v1929_v29, %v1368_v28 }
 0x74c   :  { %1743 = vtanh.f32 %v963_v35 }
 0x74d   :  { %1745 = vtanh.f32 %v965_v36 }
 0x757   :  { %v1740_v37 = vpop.eup %1739 }
 0x758   :  { %v1742_v38 = vpop.eup %1741  ;;  %v970_v39 = vadd.f32 1.0, %v1740_v37 }
 0x759   :  { %v1744_v40 = vpop.eup %1743  ;;  %v972_v41 = vadd.f32 1.0, %v1742_v38  ;;  %v1375_v38 = vrot.slane %v72_v34, %v1919_v24 }
 0x75a   :  { %v1746_v43 = vpop.eup %1745  ;;  %v971_v44 = vadd.f32 1.0, %v1744_v40  ;;  %v974_v45 = vmul.f32 0.5, %v970_v39 }
 0x75b   :  { %v973_v46 = vadd.f32 1.0, %v1746_v43  ;;  %v976_v47 = vmul.f32 0.5, %v972_v41 }
 0x75c   :  { %v975_v48 = vmul.f32 0.5, %v971_v44  ;;  %v978_v50 = vmul.f32 %v974_v45, %v899_v4 }
 0x75d   :  { %v977_v49 = vmul.f32 0.5, %v973_v46  ;;  %v980_v52 = vmul.f32 %v976_v47, %v940_v6 }
 0x75e   :  { %v979_v51 = vmul.f32 %v975_v48, %v901_v11  ;;  %v982_v56 = vpack.c.bf16 %v978_v50, %v978_v50 }
 0x75f   :  { %v981_v53 = vmul.f32 %v977_v49, %v942_v12  ;;  %v984_v57 = vpack.c.bf16 %v980_v52, %v980_v52 }
 0x760   :  { %v983_v54 = vpack.c.bf16 %v979_v51, %v979_v51 }
 0x761   :  { %v985_v55 = vpack.c.bf16 %v981_v53, %v981_v53 }
 0x762   :  { %1278 = vmatprep.mubr.bf16.mxu1 %v983_v54 }
 0x763   :  { %1318 = vmatprep.mubr.bf16.mxu0 %v985_v55  ;;  %1279 = vmatmul.mubr.bf16.vlgmr.msra.gmra.mxu1 %v982_v56 }
 0x764   :  { %1319 = vmatmul.mubr.bf16.vlgmr.msra.gmra.mxu0 %v984_v57 }
 0x823   :  { %v1530_v59 = vpop.f32.mrf.mxu1 }
 0x824   :  { %v1552_v60 = vpop.f32.mrf.mxu0 }
 0x825   :  { %v1531_v62 = vpop.f32.mrf.mxu1 }
 0x826   :  { %v1532_v63 = vadd.f32 %v1531_v62, %v1530_v59  ;;  %v1553_v1 = vpop.f32.mrf.mxu0 }
 0x827   :  { %v1533_v2 = vpop.f32.mrf.mxu1  ;;  %v1554_v4 = vadd.f32 %v1553_v1, %v1552_v60 }
 0x828   :  { %v1281_v3 = vadd.f32 %v1532_v63, %v1053_v61  ;;  %v1555_v6 = vpop.f32.mrf.mxu0 }
 0x829   :  { %v1534_v7 = vpop.f32.mrf.mxu1 }
 0x82a   :  { %v1321_v8 = vadd.f32 %v1554_v4, %v1281_v3  ;;  %v1556_v9 = vpop.f32.mrf.mxu0 }
 0x82c   :  { %v1327_v10 = vrot.slane %v1321_v8, 1  ;;  %v1330_v12 = vadd.f32 %v1321_v8, %v1996_v15 }
 0x82e   :  { %v1331_v11 = vadd.f32 %v1327_v10, %v1998_v0 }
 0x830   :  { %v1334_v13 = vrot.slane %v1331_v11, 7 }
 0x832   :  { %v1335_v14 = vsel %vm386_vm0, %v1334_v13, %v1330_v12 }
 0x833   :  { %v1337_v16 = vsel %vm597_vm3, %v1335_v14, 0.0 }
 0x834   :  { %1338 = vadd.xlane.f32.xlu0 %v1337_v16 }
 0x8bd   :  { %v1339_v20 = vpop.xlane.xlu0 %1338 }
 0x8be   :  { %v1340_v42 = vmul.f32 0.0078125, %v1339_v20 }
 0x8c0   :  { %v1342_v21 = vrot.slane %v1340_v42, 1  ;;  %v1345_v26 = vsub.f32 %v1330_v12, %v1340_v42 }
 0x8c2   :  { %v1346_v23 = vsub.f32 %v1331_v11, %v1342_v21  ;;  %v1347_v5 = vmul.f32 %v1345_v26, %v1345_v26 }
 0x8c4   :  { %v1348_v18 = vmul.f32 %v1346_v23, %v1346_v23 }
 0x8c6   :  { %v1351_v19 = vrot.slane %v1348_v18, 7 }
 0x8c8   :  { %v1352_v17 = vsel %vm386_vm0, %v1351_v19, %v1347_v5 }
 0x8c9   :  { %v1354_v0 = vsel %vm597_vm3, %v1352_v17, 0.0 }
 0x8ca   :  { %1355 = vadd.xlane.f32.xlu0 %v1354_v0 }
 0x953   :  { %v1356_v15 = vpop.xlane.xlu0 %1355 }
 0x954   :  { %v1357_v25 = vmul.f32 0.0078125, %v1356_v15 }
 0x956   :  { %v1358_v27 = vadd.f32 1e-12, %v1357_v25 }
 0x958   :  { %1747 = vrsqrt.f32 %v1358_v27 }
 0x965   :  { %v1748_v30 = vpop.eup %1747 }
 0x966   :  { %v1361_v31 = vrot.slane %v1748_v30, 1  ;;  %v1364_v32 = vmul.f32 %v1748_v30, %v1345_v26 }
 0x968   :  { %v1365_v35 = vmul.f32 %v1361_v31, %v1346_v23  ;;  %v1370_v36 = vmul.f32 %v1369_v33, %v1364_v32 }
 0x96a   :  { %v1371_v37 = vmul.f32 %v1369_v33, %v1365_v35  ;;  %v1376_v40 = vadd.f32 %v1375_v38, %v1370_v36 }
 0x96c   :  { %v1377_v39 = vadd.f32 %v1375_v38, %v1371_v37 }
 0x96e   :  { %v1380_v41 = vrot.slane %v1377_v39, 7 }
 0x970   :  { %v1381_v22 = vsel %vm386_vm0, %v1380_v41, %v1376_v40 }
 0x971   :  { %1383 = vst [vmem:[#allocation8] sm:$0x3] %v1381_v22 }
 0x972   :  { %1820 = shalt.err (!%p1817_p5)
}
 0x973   :  { %1393 = dma.vmem_to_hbm [thread:$0]  %s1391_s27, 32, %s2039_s7, [#allocation4]  }
 0x974   :  { %1833 = dma.done.wait [#allocation4], 32  }
 0x975   :  { %1834 = vsyncadd [#allocation4], 4294967264 }
 0x976   :  { %1397 = vsyncpa [#allocation3], 1 }
 0x977   :  { %1398 = vsyncpa [#allocation6], 1 }
 0x978   :  { %1399 = vsyncpa [#allocation4], 1 }

</bundles_post_ra>
